<compile_context>
chip_gen: v6e
topology: v6e:2x2x1
jax: 0.10.0
libtpu: 0.0.40
codegen_flags: <defaults>
</compile_context>

<pallas_src>
import numpy as np
import jax
import jax.numpy as jnp
from jax.experimental import pallas as pl
from jax.experimental.pallas import tpu as pltpu

LANE = 128
# Set to jnp.bfloat16 on v6e/v7x for ~2x MXU throughput (accumulation stays
# f32 via preferred_element_type).  Default f32 keeps the module's numerics.
MXU_DTYPE = jnp.float32


def _round_up(x, m):
    return ((x + m - 1) // m) * m


def _tile_rows(n, max_tile):
    """Pad a row count to a multiple of 8, pick a row tile, pad to a tile
    multiple so grid * block exactly covers the (zero-padded) array."""
    n_pad = _round_up(max(n, 1), 8)
    t = min(max_tile, n_pad)
    return _round_up(n_pad, t), t


# ----------------------------------------------------------------------------
# Pallas kernels
# ----------------------------------------------------------------------------
def _mlp_kernel(x_ref, w1_ref, b1_ref, w2_ref, b2_ref, w3_ref, b3_ref, out_ref):
    """score(x) = Linear(ReLU(Linear(ReLU(Linear(x)))))  — lane-dense output.

    Weights are zero-padded (HIDDEN->256, out 1->128) so padded lanes carry
    exactly zero; column 0 of the output is the original scalar score.
    """
    x = x_ref[...].astype(MXU_DTYPE)
    h = jnp.dot(x, w1_ref[...].astype(MXU_DTYPE),
                preferred_element_type=jnp.float32) + b1_ref[...]
    h = jnp.maximum(h, 0.0)
    h = jnp.dot(h.astype(MXU_DTYPE), w2_ref[...].astype(MXU_DTYPE),
                preferred_element_type=jnp.float32) + b2_ref[...]
    h = jnp.maximum(h, 0.0)
    out_ref[...] = (
        jnp.dot(h.astype(MXU_DTYPE), w3_ref[...].astype(MXU_DTYPE),
                preferred_element_type=jnp.float32) + b3_ref[...]
    )


def _span_fused_kernel(mask_ref, attn_row_ref, embeds_ref, se_ref, wid_ref,
                       w1a_ref, w1b_ref, w1c_ref, b1_ref,
                       w2_ref, b2_ref, w3_ref, b3_ref,
                       gi_ref, score_ref):
    """Per span-row tile: masked softmax over tokens -> MXU pooling ->
    g_i assembly (output) -> 3-layer mention-score MLP (output).

    mask:     (TS, T)   1.0 where token belongs to the span, else 0.0
    attn_row: (1,  T)   per-token attention logit (broadcast over spans)
    embeds:   (T,  E)
    se:       (TS, 2H)  [h_start ; h_end] per span
    wid:      (TS, D)   distance-bucket embedding per span
    """
    # --- masked softmax over the token axis (equivalent to PyTorch's
    #     pad_sequence(padding_value=-1e10) + softmax) ---
    mask = mask_ref[...]                                         # (TS, T)
    logits = jnp.where(mask > 0.5, attn_row_ref[...], -1e10)
    m = jnp.max(logits, axis=1, keepdims=True)
    e = jnp.exp(logits - m)
    denom = jnp.sum(e, axis=1, keepdims=True)
    p = e * pl.reciprocal(denom, approx=True)                    # softmax weights

    # --- attention-weighted span embedding on the MXU ---
    pooled = jnp.dot(p.astype(MXU_DTYPE), embeds_ref[...].astype(MXU_DTYPE),
                     preferred_element_type=jnp.float32)         # (TS, E)
    se = se_ref[...]                                             # (TS, 2H)
    wid = wid_ref[...]                                           # (TS, D)

    # --- g_i tile = [start_end | pooled | widths | 0-pad]  (module output) ---
    c0 = se.shape[1]
    c1 = c0 + pooled.shape[1]
    c2 = c1 + wid.shape[1]
    gi_ref[...] = jnp.zeros_like(gi_ref)
    gi_ref[:, 0:c0] = se
    gi_ref[:, c0:c1] = pooled
    gi_ref[:, c1:c2] = wid

    # --- mention-score MLP on the in-register tile (weights VMEM-resident).
    #     Layer 1 is split over the three g_i segments, so no in-kernel
    #     concatenate / relayout is needed:
    #     g_i @ W1 == se @ W1a + pooled @ W1b + wid @ W1c
    h = (jnp.dot(se.astype(MXU_DTYPE), w1a_ref[...].astype(MXU_DTYPE),
                 preferred_element_type=jnp.float32)
         + jnp.dot(pooled.astype(MXU_DTYPE), w1b_ref[...].astype(MXU_DTYPE),
                   preferred_element_type=jnp.float32)
         + jnp.dot(wid.astype(MXU_DTYPE), w1c_ref[...].astype(MXU_DTYPE),
                   preferred_element_type=jnp.float32)
         + b1_ref[...])
    h = jnp.maximum(h, 0.0)
    h = jnp.dot(h.astype(MXU_DTYPE), w2_ref[...].astype(MXU_DTYPE),
                preferred_element_type=jnp.float32) + b2_ref[...]
    h = jnp.maximum(h, 0.0)
    score_ref[...] = (
        jnp.dot(h.astype(MXU_DTYPE), w3_ref[...].astype(MXU_DTYPE),
                preferred_element_type=jnp.float32) + b3_ref[...]
    )


# ----------------------------------------------------------------------------
# Parameter padding
# ----------------------------------------------------------------------------
def pad_mlp_params(params, k_pad, h_pad, out_pad=LANE):
    """Zero-pad a (w1,b1,w2,b2,w3,b3) MLP to MXU/lane-aligned shapes.

    Zero rows/cols + zero biases keep the math identical: padded hidden units
    are ReLU(0)=0 and contribute nothing; output column 0 is the real score.
    """
    w1, b1, w2, b2, w3, b3 = params
    k, h = w1.shape
    w1p = jnp.zeros((k_pad, h_pad), jnp.float32).at[:k, :h].set(w1)
    b1p = jnp.zeros((1, h_pad), jnp.float32).at[:, :h].set(b1)
    w2p = jnp.zeros((h_pad, h_pad), jnp.float32).at[:h, :h].set(w2)
    b2p = jnp.zeros((1, h_pad), jnp.float32).at[:, :h].set(b2)
    w3p = jnp.zeros((h_pad, out_pad), jnp.float32).at[:h, :1].set(w3)
    b3p = jnp.zeros((1, out_pad), jnp.float32).at[:, :1].set(b3)
    return (w1p, b1p, w2p, b2p, w3p, b3p)


def split_pad_mention_params(params, seg_dims, h_pad, out_pad=LANE):
    """Split the mention-MLP layer-1 rows by g_i segment
    ([start_end | attn_embed | width]) and zero-pad hidden/out widths."""
    w1, b1, w2, b2, w3, b3 = params
    k, h = w1.shape
    d0, d1, d2 = seg_dims
    assert d0 + d1 + d2 == k
    w1p = jnp.zeros((k, h_pad), jnp.float32).at[:, :h].set(w1)
    w1a, w1b, w1c = w1p[:d0], w1p[d0:d0 + d1], w1p[d0 + d1:]
    b1p = jnp.zeros((1, h_pad), jnp.float32).at[:, :h].set(b1)
    w2p = jnp.zeros((h_pad, h_pad), jnp.float32).at[:h, :h].set(w2)
    b2p = jnp.zeros((1, h_pad), jnp.float32).at[:, :h].set(b2)
    w3p = jnp.zeros((h_pad, out_pad), jnp.float32).at[:h, :1].set(w3)
    b3p = jnp.zeros((1, out_pad), jnp.float32).at[:, :1].set(b3)
    return (w1a, w1b, w1c, b1p, w2p, b2p, w3p, b3p)


# ----------------------------------------------------------------------------
# Wrappers
# ----------------------------------------------------------------------------
def mlp_forward(x, padded_params, *, tm=512):
    """Row-tiled 3-layer MLP.  Returns (N, 1) scores (column 0 of padded out).

    Weights stay VMEM-resident across the row grid (constant index_map); x /
    out tiles are double-buffered by the BlockSpec pipeline."""
    w1, b1, w2, b2, w3, b3 = padded_params
    n, k = x.shape
    k_pad = w1.shape[0]
    out_pad = w3.shape[1]
    n_pad, tm = _tile_rows(n, tm)

    x_p = jnp.pad(x.astype(jnp.float32), ((0, n_pad - n), (0, k_pad - k)))

    out = pl.pallas_call(
        _mlp_kernel,
        grid=(n_pad // tm,),
        in_specs=[
            pl.BlockSpec((tm, k_pad), lambda i: (i, 0)),
            pl.BlockSpec(w1.shape, lambda i: (0, 0)),
            pl.BlockSpec(b1.shape, lambda i: (0, 0)),
            pl.BlockSpec(w2.shape, lambda i: (0, 0)),
            pl.BlockSpec(b2.shape, lambda i: (0, 0)),
            pl.BlockSpec(w3.shape, lambda i: (0, 0)),
            pl.BlockSpec(b3.shape, lambda i: (0, 0)),
        ],
        out_specs=pl.BlockSpec((tm, out_pad), lambda i: (i, 0)),
        out_shape=jax.ShapeDtypeStruct((n_pad, out_pad), jnp.float32),
        compiler_params=pltpu.CompilerParams(
            dimension_semantics=("parallel",)),
    )(x_p, w1, b1, w2, b2, w3, b3)
    return out[:n, 0:1]


def span_gi_scores(mask, attn_row, embeds_p, se_p, widths_p,
                   ment_params_split, *, ts):
    """Fused span pooling + g_i assembly + mention-score MLP."""
    w1a, w1b, w1c, b1, w2, b2, w3, b3 = ment_params_split
    s_pad, t_pad = mask.shape
    e = embeds_p.shape[1]
    se_dim = se_p.shape[1]
    d_dim = widths_p.shape[1]
    gi_pad = _round_up(se_dim + e + d_dim, LANE)
    out_pad = w3.shape[1]

    gi, scores = pl.pallas_call(
        _span_fused_kernel,
        grid=(s_pad // ts,),
        in_specs=[
            pl.BlockSpec((ts, t_pad), lambda i: (i, 0)),
            pl.BlockSpec((1, t_pad), lambda i: (0, 0)),
            pl.BlockSpec((t_pad, e), lambda i: (0, 0)),
            pl.BlockSpec((ts, se_dim), lambda i: (i, 0)),
            pl.BlockSpec((ts, d_dim), lambda i: (i, 0)),
            pl.BlockSpec(w1a.shape, lambda i: (0, 0)),
            pl.BlockSpec(w1b.shape, lambda i: (0, 0)),
            pl.BlockSpec(w1c.shape, lambda i: (0, 0)),
            pl.BlockSpec(b1.shape, lambda i: (0, 0)),
            pl.BlockSpec(w2.shape, lambda i: (0, 0)),
            pl.BlockSpec(b2.shape, lambda i: (0, 0)),
            pl.BlockSpec(w3.shape, lambda i: (0, 0)),
            pl.BlockSpec(b3.shape, lambda i: (0, 0)),
        ],
        out_specs=(
            pl.BlockSpec((ts, gi_pad), lambda i: (i, 0)),
            pl.BlockSpec((ts, out_pad), lambda i: (i, 0)),
        ),
        out_shape=(
            jax.ShapeDtypeStruct((s_pad, gi_pad), jnp.float32),
            jax.ShapeDtypeStruct((s_pad, out_pad), jnp.float32),
        ),
        compiler_params=pltpu.CompilerParams(
            dimension_semantics=("parallel",)),
    )(mask, attn_row, embeds_p, se_p, widths_p,
      w1a, w1b, w1c, b1, w2, b2, w3, b3)
    return gi, scores


# ----------------------------------------------------------------------------
# Host-side span bookkeeping (mirrors the PyTorch module's Python code)
# ----------------------------------------------------------------------------
class Span:
    def __init__(self, i, start, end):
        self.id, self.start, self.end = i, start, end
        self.si, self.yi = None, None

    def __len__(self):
        return self.end - self.start + 1


def remove_overlapping(sorted_spans):
    nonoverlapping, seen = [], set()
    for s in sorted_spans:
        indexes = range(s.start, s.end + 1)
        taken = [i in seen for i in indexes]
        if len(set(taken)) == 1 or taken[0] == taken[-1] == False:  # noqa: E712
            nonoverlapping.append(s)
            seen.update(indexes)
    return nonoverlapping


def prune(spans, T, LAMBDA=0.4):
    STOP = int(LAMBDA * T)
    sorted_spans = sorted(spans, key=lambda s: s.si, reverse=True)
    nonoverlapping = remove_overlapping(sorted_spans)
    pruned = nonoverlapping[:STOP]
    return sorted(pruned, key=lambda s: (s.start, s.end))


# ----------------------------------------------------------------------------
# MentionScore.forward
# ----------------------------------------------------------------------------
def mention_score_forward(states, embeds, spans, doc_len,
                          attn_params_p, ment_params_split, dist_table, k=250):
    T, lstm_out = states.shape
    E = embeds.shape[1]
    starts = np.array([s.start for s in spans], np.int32)
    ends = np.array([s.end for s in spans], np.int32)
    lengths = ends - starts + 1
    S = len(spans)

    T_pad = _round_up(T, LANE)          # lane axis of the (S, T) mask
    S_pad, ts = _tile_rows(S, 256)      # span-row tiling

    # 1) per-token attention logits (row-tiled Pallas MLP over tokens)
    attn_scores = mlp_forward(states, attn_params_p)                 # (T, 1)
    attn_row = jnp.zeros((1, T_pad), jnp.float32).at[0, :T].set(attn_scores[:, 0])

    # 2) span membership mask (vectorized numpy; no per-token Python loops)
    tok = np.arange(T_pad, dtype=np.int32)[None, :]
    starts_p = np.zeros(S_pad, np.int32); starts_p[:S] = starts
    ends_p = np.full(S_pad, -1, np.int32); ends_p[:S] = ends
    mask = jnp.asarray(
        ((tok >= starts_p[:, None]) & (tok <= ends_p[:, None])).astype(np.float32))

    embeds_p = jnp.pad(embeds.astype(jnp.float32), ((0, T_pad - T), (0, 0)))

    # 3) phi_distance: bucket span widths, embedding lookup
    bins = jnp.asarray([1, 2, 3, 4, 5, 8, 16, 32, 64], jnp.int32)
    bin_idx = jnp.sum(jnp.asarray(lengths)[:, None] >= bins[None, :], axis=1)
    widths = dist_table[bin_idx]                                     # (S, DIST)
    widths_p = jnp.zeros((S_pad, widths.shape[1]), jnp.float32).at[:S].set(widths)

    # 4) [h_start ; h_end] per span
    start_end = jnp.concatenate(
        [states[jnp.asarray(starts)], states[jnp.asarray(ends)]], axis=1)
    se_p = jnp.zeros((S_pad, 2 * lstm_out), jnp.float32).at[:S].set(start_end)

    # 5) fused kernel: masked softmax + MXU pooling + g_i + mention scores
    gi_pad, scores_pad = span_gi_scores(
        mask, attn_row, embeds_p, se_p, widths_p, ment_params_split, ts=ts)
    GI = 2 * lstm_out + E + widths.shape[1]
    g_i = gi_pad[:S, :GI]
    mention_scores = scores_pad[:S, 0:1]

    # 6) host-side pruning + antecedent assignment
    scores_np = np.asarray(mention_scores)
    for span, si in zip(spans, scores_np):
        span.si = float(si[0])
    spans = prune(spans, doc_len)
    for i, span in enumerate(spans):
        # TODO(synk): ctf=True bilinear antecedent scoring (g_i @ wctf @ g_j) not wired.
        span.yi = spans[max(0, i - k):i]

    return spans, g_i, mention_scores


# ----------------------------------------------------------------------------
# deterministic parameter init
# ----------------------------------------------------------------------------
def init_linear(key, fan_in, fan_out):
    kw, kb = jax.random.split(key)
    bound = 1.0 / np.sqrt(fan_in)
    w = jax.random.uniform(kw, (fan_in, fan_out), jnp.float32, -bound, bound)
    b = jax.random.uniform(kb, (1, fan_out), jnp.float32, -bound, bound)
    return w, b


if __name__ == "__main__":
    T = 16           # tokens in the document
    LSTM_OUT = 32    # lstm_out_dim
    EMBED = 32       # word embedding dim
    DIST = 20        # distance_dim
    HIDDEN = 150     # mlp hidden_dim (module default)
    GI = 2 * LSTM_OUT + EMBED + DIST   # gi_dim = 116
    HIDDEN_PAD = 256                   # MXU-aligned hidden width (zero-padded)

    key = jax.random.PRNGKey(0)
    keys = jax.random.split(key, 10)
    states = jax.random.normal(keys[0], (T, LSTM_OUT), jnp.float32)
    embeds = jax.random.normal(keys[1], (T, EMBED), jnp.float32)

    attn_params = (
        *init_linear(keys[2], LSTM_OUT, HIDDEN),
        *init_linear(keys[3], HIDDEN, HIDDEN),
        *init_linear(keys[4], HIDDEN, 1),
    )
    ment_params = (
        *init_linear(keys[5], GI, HIDDEN),
        *init_linear(keys[6], HIDDEN, HIDDEN),
        *init_linear(keys[7], HIDDEN, 1),
    )
    # pad once (zero rows/cols -> identical math, lane/MXU-aligned shapes)
    attn_params_p = pad_mlp_params(attn_params, _round_up(LSTM_OUT, LANE), HIDDEN_PAD)
    ment_params_split = split_pad_mention_params(
        ment_params, (2 * LSTM_OUT, EMBED, DIST), HIDDEN_PAD)

    dist_table = jax.random.normal(keys[8], (10, DIST), jnp.float32)  # Embedding(len(bins)+1, DIST)

    # doc.spans(): all spans of width <= 4
    MAXW = 4
    spans = [Span(i, s, e)
             for i, (s, e) in enumerate((s, e) for s in range(T)
                                        for e in range(s, min(s + MAXW, T)))]

    spans_out, g_i, mention_scores = mention_score_forward(
        states, embeds, spans, T, attn_params_p, ment_params_split, dist_table)
    jax.block_until_ready((g_i, mention_scores))

    assert g_i.shape == (len(spans), GI)
    assert mention_scores.shape == (len(spans), 1)
    assert bool(jnp.all(jnp.isfinite(mention_scores)))
    print("KERNEL_OK")
</pallas_src>

<mosaic_0001>
module attributes {stable_mosaic.version = 11 : i64} {
  func.func @_mlp_kernel(%arg0: i32, %arg1: memref<16x128xf32, #tpu.memory_space<vmem>>, %arg2: memref<128x256xf32, #tpu.memory_space<vmem>>, %arg3: memref<1x256xf32, #tpu.memory_space<vmem>>, %arg4: memref<256x256xf32, #tpu.memory_space<vmem>>, %arg5: memref<1x256xf32, #tpu.memory_space<vmem>>, %arg6: memref<256x128xf32, #tpu.memory_space<vmem>>, %arg7: memref<1x128xf32, #tpu.memory_space<vmem>>, %arg8: memref<16x128xf32, #tpu.memory_space<vmem>>) attributes {dimension_semantics = [#tpu.dimension_semantics<parallel>], iteration_bounds = array<i64: 1>, scalar_prefetch = 0 : i64, scratch_operands = 0 : i64, tpu.core_type = #tpu.core_type<tc>, window_params = [{transform_indices = @transform_0, window_bounds = array<i64: 16, 128>}, {pipeline_mode = #tpu.pipeline_mode<synchronous>, transform_indices = @transform_1, window_bounds = array<i64: 128, 256>}, {pipeline_mode = #tpu.pipeline_mode<synchronous>, transform_indices = @transform_2, window_bounds = array<i64: 1, 256>}, {pipeline_mode = #tpu.pipeline_mode<synchronous>, transform_indices = @transform_3, window_bounds = array<i64: 256, 256>}, {pipeline_mode = #tpu.pipeline_mode<synchronous>, transform_indices = @transform_4, window_bounds = array<i64: 1, 256>}, {pipeline_mode = #tpu.pipeline_mode<synchronous>, transform_indices = @transform_5, window_bounds = array<i64: 256, 128>}, {pipeline_mode = #tpu.pipeline_mode<synchronous>, transform_indices = @transform_6, window_bounds = array<i64: 1, 128>}, {transform_indices = @transform_7, window_bounds = array<i64: 16, 128>}]} {
    %c0 = arith.constant 0 : index
    %c0_0 = arith.constant 0 : index
    %0 = vector.load %arg1[%c0, %c0_0] : memref<16x128xf32, #tpu.memory_space<vmem>>, vector<16x128xf32>
    %c0_1 = arith.constant 0 : index
    %c0_2 = arith.constant 0 : index
    %1 = vector.load %arg2[%c0_1, %c0_2] : memref<128x256xf32, #tpu.memory_space<vmem>>, vector<128x256xf32>
    %cst = arith.constant dense<0.000000e+00> : vector<16x256xf32>
    %2 = tpu.matmul %0, %1, %cst {dimension_numbers = #tpu.dot_dimension_numbers<[1], [0], [0], [1], [0, 0, 1, 1], [], []>} : vector<16x128xf32>, vector<128x256xf32>, vector<16x256xf32> -> vector<16x256xf32>
    %c0_3 = arith.constant 0 : index
    %c0_4 = arith.constant 0 : index
    %3 = vector.load %arg3[%c0_3, %c0_4] : memref<1x256xf32, #tpu.memory_space<vmem>>, vector<1x256xf32>
    %4 = vector.broadcast %3 : vector<1x256xf32> to vector<16x256xf32>
    %5 = arith.addf %2, %4 : vector<16x256xf32>
    %cst_5 = arith.constant 0.000000e+00 : f32
    %6 = vector.broadcast %cst_5 : f32 to vector<16x256xf32>
    %7 = arith.maximumf %5, %6 : vector<16x256xf32>
    %c0_6 = arith.constant 0 : index
    %c0_7 = arith.constant 0 : index
    %8 = vector.load %arg4[%c0_6, %c0_7] : memref<256x256xf32, #tpu.memory_space<vmem>>, vector<256x256xf32>
    %cst_8 = arith.constant dense<0.000000e+00> : vector<16x256xf32>
    %9 = tpu.matmul %7, %8, %cst_8 {dimension_numbers = #tpu.dot_dimension_numbers<[1], [0], [0], [1], [0, 0, 1, 1], [], []>} : vector<16x256xf32>, vector<256x256xf32>, vector<16x256xf32> -> vector<16x256xf32>
    %c0_9 = arith.constant 0 : index
    %c0_10 = arith.constant 0 : index
    %10 = vector.load %arg5[%c0_9, %c0_10] : memref<1x256xf32, #tpu.memory_space<vmem>>, vector<1x256xf32>
    %11 = vector.broadcast %10 : vector<1x256xf32> to vector<16x256xf32>
    %12 = arith.addf %9, %11 : vector<16x256xf32>
    %cst_11 = arith.constant 0.000000e+00 : f32
    %13 = vector.broadcast %cst_11 : f32 to vector<16x256xf32>
    %14 = arith.maximumf %12, %13 : vector<16x256xf32>
    %c0_12 = arith.constant 0 : index
    %c0_13 = arith.constant 0 : index
    %15 = vector.load %arg6[%c0_12, %c0_13] : memref<256x128xf32, #tpu.memory_space<vmem>>, vector<256x128xf32>
    %cst_14 = arith.constant dense<0.000000e+00> : vector<16x128xf32>
    %16 = tpu.matmul %14, %15, %cst_14 {dimension_numbers = #tpu.dot_dimension_numbers<[1], [0], [0], [1], [0, 0, 1, 1], [], []>} : vector<16x256xf32>, vector<256x128xf32>, vector<16x128xf32> -> vector<16x128xf32>
    %c0_15 = arith.constant 0 : index
    %c0_16 = arith.constant 0 : index
    %17 = vector.load %arg7[%c0_15, %c0_16] : memref<1x128xf32, #tpu.memory_space<vmem>>, vector<1x128xf32>
    %18 = vector.broadcast %17 : vector<1x128xf32> to vector<16x128xf32>
    %19 = arith.addf %16, %18 : vector<16x128xf32>
    %c0_17 = arith.constant 0 : index
    %c0_18 = arith.constant 0 : index
    %20 = vector.load %arg8[%c0_17, %c0_18] : memref<16x128xf32, #tpu.memory_space<vmem>>, vector<16x128xf32>
    tpu.vector_store %arg8[%c0_17, %c0_18], %19 {strides = array<i32>} : memref<16x128xf32, #tpu.memory_space<vmem>>, vector<16x128xf32>,
    return
  }
  func.func @transform_0(%arg0: i32) -> (i32, i32) {
    %c0_i32 = arith.constant 0 : i32
    %c0_i32_0 = arith.constant 0 : i32
    return %arg0, %c0_i32 : i32, i32
  }
  func.func @transform_1(%arg0: i32) -> (i32, i32) {
    %c0_i32 = arith.constant 0 : i32
    %c0_i32_0 = arith.constant 0 : i32
    %c0_i32_1 = arith.constant 0 : i32
    return %c0_i32, %c0_i32_0 : i32, i32
  }
  func.func @transform_2(%arg0: i32) -> (i32, i32) {
    %c0_i32 = arith.constant 0 : i32
    %c0_i32_0 = arith.constant 0 : i32
    %c0_i32_1 = arith.constant 0 : i32
    return %c0_i32, %c0_i32_0 : i32, i32
  }
  func.func @transform_3(%arg0: i32) -> (i32, i32) {
    %c0_i32 = arith.constant 0 : i32
    %c0_i32_0 = arith.constant 0 : i32
    %c0_i32_1 = arith.constant 0 : i32
    return %c0_i32, %c0_i32_0 : i32, i32
  }
  func.func @transform_4(%arg0: i32) -> (i32, i32) {
    %c0_i32 = arith.constant 0 : i32
    %c0_i32_0 = arith.constant 0 : i32
    %c0_i32_1 = arith.constant 0 : i32
    return %c0_i32, %c0_i32_0 : i32, i32
  }
  func.func @transform_5(%arg0: i32) -> (i32, i32) {
    %c0_i32 = arith.constant 0 : i32
    %c0_i32_0 = arith.constant 0 : i32
    %c0_i32_1 = arith.constant 0 : i32
    return %c0_i32, %c0_i32_0 : i32, i32
  }
  func.func @transform_6(%arg0: i32) -> (i32, i32) {
    %c0_i32 = arith.constant 0 : i32
    %c0_i32_0 = arith.constant 0 : i32
    %c0_i32_1 = arith.constant 0 : i32
    return %c0_i32, %c0_i32_0 : i32, i32
  }
  func.func @transform_7(%arg0: i32) -> (i32, i32) {
    %c0_i32 = arith.constant 0 : i32
    %c0_i32_0 = arith.constant 0 : i32
    return %arg0, %c0_i32 : i32, i32
  }
}

</mosaic_0001>

<bundles_post_ra>
// kernel: tpu_custom_call.1
= control target key start
LH: loop header
LB: loop body
LE: loop exit
PB: predicated region body
PF: predicated region fallthrough
CT: control target
= control target key end

     0   :  { %12 = vsyncpa [#allocation3], 0  ;;  %s749_s0 = inlined_call_operand.hbm [shape: f32[16,128], index: 0, kind: input, shape index: {}]   ;;  %s750_s1 = inlined_call_operand.hbm [shape: f32[128,256], index: 1, kind: input, shape index: {}]   ;;  %s751_s2 = inlined_call_operand.vmem [shape: f32[1,256], index: 2, kind: input, shape index: {}]   ;;  %s752_s3 = inlined_call_operand.hbm [shape: f32[256,256], index: 3, kind: input, shape index: {}]   ;;  %s753_s4 = inlined_call_operand.vmem [shape: f32[1,256], index: 4, kind: input, shape index: {}]   ;;  %s754_s5 = inlined_call_operand.hbm [shape: f32[256,128], index: 5, kind: input, shape index: {}]   ;;  %s755_s6 = inlined_call_operand.vmem [shape: f32[1,128], index: 6, kind: input, shape index: {}]   ;;  %s756_s7 = inlined_call_operand.hbm [shape: f32[16,128], index: 7, kind: output, shape index: {}]  }
   0x1   :  { %13 = vsyncpa [#allocation6], 0 }
   0x2   :  { %14 = vsyncpa [#allocation9], 0 }
   0x3   :  { %15 = vsyncpa [#allocation4], 0  ;;  %s658_s24 = smov [#allocation5]  }
   0x4   :  { %s33_s25 = sshll.u32 %s658_s24, 4  ;;  %s34_s25 = int_to_ptr.vmem [resolvable:$true] %s33_s25 }
   0x5   :  { %s558_s26 = scalar_lea.vmem %s34_s25, 4096  ;;  %p563_p1 = scmp.lt.s32.totalorder %s34_s25, %s34_s25 }
   0x6   :  { %p559_p0 = scmp.ne.s32.totalorder %s34_s25, %s558_s26  ;;  %p564_p2 = scmp.lt.s32.totalorder %s558_s26, %s558_s26 }
   0x8   :  { %p565_p3 = por %p564_p2, %p563_p1 }
   0xa   :  { %p566_p4 = pnand %p565_p3, %p559_p0 }
   0xc   :  { %569 = shalt.err (!%p566_p4)
}
   0xd   :  { %s659_s27 = smov 256   ;;  %s660_s28 = smov 16  }
   0xe   :  { %39 = dma.hbm_to_vmem [thread:$0]  %s750_s1, 4096, %s34_s25, [#allocation6], %s659_s27, %s659_s27, %s660_s28  }
   0xf   :  { %s661_s8 = smov [#allocation2]  }
  0x10   :  { %s21_s9 = sshll.u32 %s661_s8, 4  ;;  %s22_s9 = int_to_ptr.vmem [resolvable:$true] %s21_s9 }
  0x11   :  { %s578_s10 = scalar_lea.vmem %s22_s9, 256  ;;  %p583_p6 = scmp.lt.s32.totalorder %s22_s9, %s22_s9 }
  0x12   :  { %p579_p5 = scmp.ne.s32.totalorder %s22_s9, %s578_s10  ;;  %p584_p7 = scmp.lt.s32.totalorder %s578_s10, %s578_s10 }
  0x14   :  { %p585_p8 = por %p584_p7, %p583_p6 }
  0x16   :  { %p586_p9 = pnand %p585_p8, %p579_p5 }
  0x18   :  { %589 = shalt.err (!%p586_p9)
}
  0x19   :  { %s662_s11 = smov 128   ;;  %s663_s12 = smov 8  }
  0x1a   :  { %27 = dma.hbm_to_vmem [thread:$0]  %s749_s0, 256, %s22_s9, [#allocation3], %s662_s11, %s662_s11, %s663_s12  }
  0x1b   :  { %s664_s1 = smov [#allocation7]   ;;  %s665_s16 = smov [#allocation8]  }
  0x1c   :  { %s47_s15 = sshll.u32 %s664_s1, 4  ;;  %s61_s17 = sshll.u32 %s665_s16, 4  ;;  %s48_s15 = int_to_ptr.vmem [resolvable:$true] %s47_s15  ;;  %s62_s17 = int_to_ptr.vmem [resolvable:$true] %s61_s17 }
  0x1d   :  { %s598_s18 = scalar_lea.vmem %s48_s15, 8192  ;;  %p603_p11 = scmp.lt.s32.totalorder %s48_s15, %s48_s15 }
  0x1e   :  { %p599_p10 = scmp.ne.s32.totalorder %s48_s15, %s598_s18  ;;  %p604_p12 = scmp.lt.s32.totalorder %s598_s18, %s598_s18 }
  0x20   :  { %p605_p13 = por %p604_p12, %p603_p11 }
  0x22   :  { %p606_p0 = pnand %p605_p13, %p599_p10 }
  0x24   :  { %609 = shalt.err (!%p606_p0)
}
  0x25   :  { %53 = dma.hbm_to_vmem [thread:$0]  %s752_s3, 8192, %s48_s15, [#allocation6], %s659_s27, %s659_s27, %s660_s28  }
  0x26   :  { %s618_s0 = scalar_lea.vmem %s62_s17, 4096  ;;  %p623_p2 = scmp.lt.s32.totalorder %s62_s17, %s62_s17 }
  0x27   :  { %p619_p1 = scmp.ne.s32.totalorder %s62_s17, %s618_s0  ;;  %p624_p3 = scmp.lt.s32.totalorder %s618_s0, %s618_s0 }
  0x29   :  { %p625_p4 = por %p624_p3, %p623_p2 }
  0x2b   :  { %p626_p5 = pnand %p625_p4, %p619_p1 }
  0x2d   :  { %629 = shalt.err (!%p626_p5)
}
  0x2e   :  { %67 = dma.hbm_to_vmem [thread:$0]  %s754_s5, 4096, %s62_s17, [#allocation9], %s662_s11, %s662_s11, %s663_s12  }
  0x2f   :  { %650 = dma.done.wait [#allocation3], 256  }
  0x30   :  { %651 = vsyncadd [#allocation3], 4294967040 }
  0x31   :  { %652 = dma.done.wait [#allocation6], 12288  }
  0x32   :  { %653 = vsyncadd [#allocation6], 4294955008 }
  0x33   :  { %654 = dma.done.wait [#allocation9], 4096  }
  0x34   :  { %655 = vsyncadd [#allocation9], 4294963200  ;;  %v666_v0 = vmov 0.0   ;;  %v115_v1 = vld [vmem:[#allocation5 + $0xf8] sm:$0xff]  ;;  %v114_v2 = vld [vmem:[#allocation5 + $0xf0] sm:$0xff]  ;;  %s667_s25 = smov [#allocation10]  }
  0x35   :  { %192 = vmatprep.mubr.f32.mxu0 %v666_v0  ;;  %v113_v3 = vld [vmem:[#allocation5 + $0xe8] sm:$0xff]  ;;  %128 = vmatprep.subr.mxu0 %v115_v1  ;;  %v112_v4 = vld [vmem:[#allocation5 + $0xe0] sm:$0xff]  ;;  %v111_v5 = vld [vmem:[#allocation5 + $0xd8] sm:$0xff]  ;;  %s487_s26 = sshll.u32 %s667_s25, 4  ;;  %s488_s26 = int_to_ptr.vmem [resolvable:$true] %s487_s26 }
  0x36   :  { %129 = vmatpush1.msra.mxu0 %v114_v2  ;;  %v110_v6 = vld [vmem:[#allocation5 + $0xd0] sm:$0xff]  ;;  %v109_v7 = vld [vmem:[#allocation5 + $0xc8] sm:$0xff]  ;;  %v108_v8 = vld [vmem:[#allocation5 + $0xc0] sm:$0xff]  ;;  %s630_s27 = scalar_lea.vmem %s488_s26, 256  ;;  %p635_p7 = scmp.lt.s32.totalorder %s488_s26, %s488_s26 }
  0x37   :  { %130 = vmatprep.subr.mxu0 %v113_v3  ;;  %v107_v9 = vld [vmem:[#allocation5 + $0xb8] sm:$0xff]  ;;  %v106_v10 = vld [vmem:[#allocation5 + $0xb0] sm:$0xff]  ;;  %v105_v11 = vld [vmem:[#allocation5 + $0xa8] sm:$0xff]  ;;  %p631_p6 = scmp.ne.s32.totalorder %s488_s26, %s630_s27  ;;  %p636_p8 = scmp.lt.s32.totalorder %s630_s27, %s630_s27 }
  0x38   :  { %131 = vmatpush1.msra.mxu0 %v112_v4  ;;  %v104_v12 = vld [vmem:[#allocation5 + $0xa0] sm:$0xff]  ;;  %v103_v13 = vld [vmem:[#allocation5 + $0x98] sm:$0xff]  ;;  %v102_v14 = vld [vmem:[#allocation5 + $0x90] sm:$0xff] }
  0x39   :  { %132 = vmatprep.subr.mxu0 %v111_v5  ;;  %v240_v15 = vld [vmem:[#allocation7 + $0xf8] sm:$0xff]  ;;  %v239_v16 = vld [vmem:[#allocation7 + $0xf0] sm:$0xff]  ;;  %v101_v17 = vld [vmem:[#allocation5 + $0x88] sm:$0xff]  ;;  %p637_p9 = por %p636_p8, %p635_p7 }
  0x3a   :  { %133 = vmatpush1.msra.mxu0 %v110_v6  ;;  %285 = vmatprep.subr.mxu1 %v240_v15  ;;  %v238_v18 = vld [vmem:[#allocation7 + $0xe8] sm:$0xff]  ;;  %v237_v19 = vld [vmem:[#allocation7 + $0xe0] sm:$0xff]  ;;  %v236_v21 = vld [vmem:[#allocation7 + $0xd8] sm:$0xff] }
  0x3b   :  { %134 = vmatprep.subr.mxu0 %v109_v7  ;;  %v100_v20 = vld [vmem:[#allocation5 + $0x80] sm:$0xff]  ;;  %286 = vmatpush1.msra.mxu1 %v239_v16  ;;  %v99_v22 = vld [vmem:[#allocation5 + $0x78] sm:$0xff]  ;;  %v235_v23 = vld [vmem:[#allocation7 + $0xd0] sm:$0xff]  ;;  %p638_p10 = pnand %p637_p9, %p631_p6 }
  0x3c   :  { %135 = vmatpush1.msra.mxu0 %v108_v8  ;;  %287 = vmatprep.subr.mxu1 %v238_v18  ;;  %v98_v24 = vld [vmem:[#allocation5 + $0x70] sm:$0xff]  ;;  %v234_v25 = vld [vmem:[#allocation7 + $0xc8] sm:$0xff]  ;;  %v233_v27 = vld [vmem:[#allocation7 + $0xc0] sm:$0xff] }
  0x3d   :  { %136 = vmatprep.subr.mxu0 %v107_v9  ;;  %288 = vmatpush1.msra.mxu1 %v237_v19  ;;  %v97_v26 = vld [vmem:[#allocation5 + $0x68] sm:$0xff]  ;;  %v96_v28 = vld [vmem:[#allocation5 + $0x60] sm:$0xff]  ;;  %v232_v29 = vld [vmem:[#allocation7 + $0xb8] sm:$0xff] }
  0x3e   :  { %137 = vmatpush1.msra.mxu0 %v106_v10  ;;  %289 = vmatprep.subr.mxu1 %v236_v21  ;;  %v95_v30 = vld [vmem:[#allocation5 + $0x58] sm:$0xff]  ;;  %v231_v31 = vld [vmem:[#allocation7 + $0xb0] sm:$0xff]  ;;  %v230_v33 = vld [vmem:[#allocation7 + $0xa8] sm:$0xff] }
  0x3f   :  { %138 = vmatprep.subr.mxu0 %v105_v11  ;;  %290 = vmatpush1.msra.mxu1 %v235_v23  ;;  %v94_v32 = vld [vmem:[#allocation5 + $0x50] sm:$0xff]  ;;  %v93_v34 = vld [vmem:[#allocation5 + $0x48] sm:$0xff]  ;;  %v229_v35 = vld [vmem:[#allocation7 + $0xa0] sm:$0xff] }
  0x40   :  { %139 = vmatpush1.msra.mxu0 %v104_v12  ;;  %291 = vmatprep.subr.mxu1 %v234_v25  ;;  %v92_v36 = vld [vmem:[#allocation5 + $0x40] sm:$0xff]  ;;  %v228_v37 = vld [vmem:[#allocation7 + $0x98] sm:$0xff]  ;;  %v227_v39 = vld [vmem:[#allocation7 + $0x90] sm:$0xff] }
  0x41   :  { %140 = vmatprep.subr.mxu0 %v103_v13  ;;  %292 = vmatpush1.msra.mxu1 %v233_v27  ;;  %v91_v38 = vld [vmem:[#allocation5 + $0x38] sm:$0xff]  ;;  %v90_v40 = vld [vmem:[#allocation5 + $0x30] sm:$0xff]  ;;  %v226_v41 = vld [vmem:[#allocation7 + $0x88] sm:$0xff] }
  0x42   :  { %141 = vmatpush1.msra.mxu0 %v102_v14  ;;  %293 = vmatprep.subr.mxu1 %v232_v29  ;;  %v89_v42 = vld [vmem:[#allocation5 + $0x28] sm:$0xff]  ;;  %v225_v43 = vld [vmem:[#allocation7 + $0x80] sm:$0xff]  ;;  %v224_v45 = vld [vmem:[#allocation7 + $0x78] sm:$0xff] }
  0x43   :  { %142 = vmatprep.subr.mxu0 %v101_v17  ;;  %294 = vmatpush1.msra.mxu1 %v231_v31  ;;  %v88_v44 = vld [vmem:[#allocation5 + $0x20] sm:$0xff]  ;;  %v87_v46 = vld [vmem:[#allocation5 + $0x18] sm:$0xff]  ;;  %v223_v47 = vld [vmem:[#allocation7 + $0x70] sm:$0xff] }
  0x44   :  { %143 = vmatpush1.msra.mxu0 %v100_v20  ;;  %295 = vmatprep.subr.mxu1 %v230_v33  ;;  %v86_v48 = vld [vmem:[#allocation5 + $0x10] sm:$0xff]  ;;  %v222_v49 = vld [vmem:[#allocation7 + $0x68] sm:$0xff]  ;;  %v221_v51 = vld [vmem:[#allocation7 + $0x60] sm:$0xff] }
  0x45   :  { %144 = vmatprep.subr.mxu0 %v99_v22  ;;  %296 = vmatpush1.msra.mxu1 %v229_v35  ;;  %v85_v50 = vld [vmem:[#allocation5 + $0x8] sm:$0xff]  ;;  %v84_v52 = vld [vmem:[#allocation5] sm:$0xff]  ;;  %v220_v53 = vld [vmem:[#allocation7 + $0x58] sm:$0xff] }
  0x46   :  { %145 = vmatpush1.msra.mxu0 %v98_v24  ;;  %297 = vmatprep.subr.mxu1 %v228_v37  ;;  %v82_v54 = vld [vmem:[#allocation2] sm:$0xff]  ;;  %v218_v56 = vld [vmem:[#allocation7 + $0x48] sm:$0xff]  ;;  %v217_v57 = vld [vmem:[#allocation7 + $0x40] sm:$0xff] }
  0x47   :  { %146 = vmatprep.subr.mxu0 %v97_v26  ;;  %298 = vmatpush1.msra.mxu1 %v227_v39  ;;  %v219_v55 = vld [vmem:[#allocation7 + $0x50] sm:$0xff]  ;;  %v216_v58 = vld [vmem:[#allocation7 + $0x38] sm:$0xff]  ;;  %v214_v61 = vld [vmem:[#allocation7 + $0x28] sm:$0xff] }
  0x48   :  { %147 = vmatpush1.msra.mxu0 %v96_v28  ;;  %299 = vmatprep.subr.mxu1 %v226_v41  ;;  %v83_v59 = vld [vmem:[#allocation2 + $0x8] sm:$0xff]  ;;  %v215_v60 = vld [vmem:[#allocation7 + $0x30] sm:$0xff]  ;;  %v213_v62 = vld [vmem:[#allocation7 + $0x20] sm:$0xff] }
  0x49   :  { %148 = vmatprep.subr.mxu0 %v95_v30  ;;  %300 = vmatpush1.msra.mxu1 %v225_v43  ;;  %v212_v63 = vld [vmem:[#allocation7 + $0x18] sm:$0xff]  ;;  %v211_v1 = vld [vmem:[#allocation7 + $0x10] sm:$0xff]  ;;  %v210_v2 = vld [vmem:[#allocation7 + $0x8] sm:$0xff] }
  0x4a   :  { %149 = vmatpush1.msra.mxu0 %v94_v32  ;;  %301 = vmatprep.subr.mxu1 %v224_v45  ;;  %v209_v3 = vld [vmem:[#allocation7] sm:$0xff]  ;;  %v272_v4 = vld [vmem:[#allocation7 + $0x1f8] sm:$0xff]  ;;  %v270_v5 = vld [vmem:[#allocation7 + $0x1e8] sm:$0xff] }
  0x4b   :  { %150 = vmatprep.subr.mxu0 %v93_v34  ;;  %302 = vmatpush1.msra.mxu1 %v223_v47  ;;  %v269_v6 = vld [vmem:[#allocation7 + $0x1e0] sm:$0xff]  ;;  %v268_v7 = vld [vmem:[#allocation7 + $0x1d8] sm:$0xff]  ;;  %v267_v8 = vld [vmem:[#allocation7 + $0x1d0] sm:$0xff] }
  0x4c   :  { %151 = vmatpush1.msra.mxu0 %v92_v36  ;;  %303 = vmatprep.subr.mxu1 %v222_v49  ;;  %v266_v9 = vld [vmem:[#allocation7 + $0x1c8] sm:$0xff]  ;;  %v265_v10 = vld [vmem:[#allocation7 + $0x1c0] sm:$0xff]  ;;  %v264_v11 = vld [vmem:[#allocation7 + $0x1b8] sm:$0xff] }
  0x4d   :  { %152 = vmatprep.subr.mxu0 %v91_v38  ;;  %304 = vmatpush1.msra.mxu1 %v221_v51  ;;  %v263_v12 = vld [vmem:[#allocation7 + $0x1b0] sm:$0xff]  ;;  %v262_v13 = vld [vmem:[#allocation7 + $0x1a8] sm:$0xff]  ;;  %v261_v14 = vld [vmem:[#allocation7 + $0x1a0] sm:$0xff] }
  0x4e   :  { %153 = vmatpush1.msra.mxu0 %v90_v40  ;;  %305 = vmatprep.subr.mxu1 %v220_v53  ;;  %v260_v15 = vld [vmem:[#allocation7 + $0x198] sm:$0xff]  ;;  %v259_v16 = vld [vmem:[#allocation7 + $0x190] sm:$0xff]  ;;  %v258_v17 = vld [vmem:[#allocation7 + $0x188] sm:$0xff] }
  0x4f   :  { %154 = vmatprep.subr.mxu0 %v89_v42  ;;  %306 = vmatpush1.msra.mxu1 %v219_v55  ;;  %v257_v18 = vld [vmem:[#allocation7 + $0x180] sm:$0xff]  ;;  %v256_v19 = vld [vmem:[#allocation7 + $0x178] sm:$0xff]  ;;  %v255_v20 = vld [vmem:[#allocation7 + $0x170] sm:$0xff] }
  0x50   :  { %155 = vmatpush1.msra.mxu0 %v88_v44  ;;  %307 = vmatprep.subr.mxu1 %v218_v56  ;;  %v254_v21 = vld [vmem:[#allocation7 + $0x168] sm:$0xff]  ;;  %v253_v22 = vld [vmem:[#allocation7 + $0x160] sm:$0xff]  ;;  %v252_v23 = vld [vmem:[#allocation7 + $0x158] sm:$0xff] }
  0x51   :  { %156 = vmatprep.subr.mxu0 %v87_v46  ;;  %308 = vmatpush1.msra.mxu1 %v217_v57  ;;  %v251_v24 = vld [vmem:[#allocation7 + $0x150] sm:$0xff]  ;;  %v250_v25 = vld [vmem:[#allocation7 + $0x148] sm:$0xff]  ;;  %v249_v26 = vld [vmem:[#allocation7 + $0x140] sm:$0xff] }
  0x52   :  { %157 = vmatpush1.msra.mxu0 %v86_v48  ;;  %309 = vmatprep.subr.mxu1 %v216_v58  ;;  %v248_v27 = vld [vmem:[#allocation7 + $0x138] sm:$0xff]  ;;  %v247_v28 = vld [vmem:[#allocation7 + $0x130] sm:$0xff]  ;;  %v246_v29 = vld [vmem:[#allocation7 + $0x128] sm:$0xff] }
  0x53   :  { %158 = vmatprep.subr.mxu0 %v85_v50  ;;  %310 = vmatpush1.msra.mxu1 %v215_v60  ;;  %v245_v30 = vld [vmem:[#allocation7 + $0x120] sm:$0xff]  ;;  %v244_v31 = vld [vmem:[#allocation7 + $0x118] sm:$0xff]  ;;  %v243_v32 = vld [vmem:[#allocation7 + $0x110] sm:$0xff] }
  0x54   :  { %159 = vmatpush1.msra.mxu0 %v84_v52  ;;  %311 = vmatprep.subr.mxu1 %v214_v61  ;;  %v242_v33 = vld [vmem:[#allocation7 + $0x108] sm:$0xff]  ;;  %v241_v34 = vld [vmem:[#allocation7 + $0x100] sm:$0xff]  ;;  %v397_v35 = vld [vmem:[#allocation8 + $0xf8] sm:$0xff] }
  0x55   :  { %193 = vmatmul.mubr.f32.vlgmr.msra.gmra.mxu0 %v82_v54  ;;  %312 = vmatpush1.msra.mxu1 %v213_v62  ;;  %v381_v36 = vld [vmem:[#allocation8 + $0x78] sm:$0xff]  ;;  %v396_v37 = vld [vmem:[#allocation8 + $0xf0] sm:$0xff]  ;;  %v395_v39 = vld [vmem:[#allocation8 + $0xe8] sm:$0xff] }
  0x56   :  { %198 = vmatprep.mubr.f32.mxu0 %v666_v0  ;;  %313 = vmatprep.subr.mxu1 %v212_v63  ;;  %v271_v0 = vld [vmem:[#allocation7 + $0x1f0] sm:$0xff]  ;;  %v379_v40 = vld [vmem:[#allocation8 + $0x68] sm:$0xff]  ;;  %v394_v41 = vld [vmem:[#allocation8 + $0xe0] sm:$0xff] }
  0x57   :  { %314 = vmatpush1.msra.mxu1 %v211_v1  ;;  %502 = vmatprep.subr.mxu0 %v397_v35  ;;  %v380_v38 = vld [vmem:[#allocation8 + $0x70] sm:$0xff]  ;;  %v378_v42 = vld [vmem:[#allocation8 + $0x60] sm:$0xff]  ;;  %v393_v43 = vld [vmem:[#allocation8 + $0xd8] sm:$0xff] }
  0x58   :  { %315 = vmatprep.subr.mxu1 %v210_v2  ;;  %503 = vmatpush3.msra.mxu0 %v381_v36  ;;  %v377_v44 = vld [vmem:[#allocation8 + $0x58] sm:$0xff]  ;;  %v392_v45 = vld [vmem:[#allocation8 + $0xd0] sm:$0xff]  ;;  %v391_v47 = vld [vmem:[#allocation8 + $0xc8] sm:$0xff] }
  0x59   :  { %199 = vmatmul.mubr.f32.gmra.mxu0 %v83_v59  ;;  %316 = vmatpush1.msra.mxu1 %v209_v3  ;;  %v376_v46 = vld [vmem:[#allocation8 + $0x50] sm:$0xff]  ;;  %v375_v48 = vld [vmem:[#allocation8 + $0x48] sm:$0xff]  ;;  %v390_v49 = vld [vmem:[#allocation8 + $0xc0] sm:$0xff]  ;;  %v118_v59 = vlaneseq }
  0x5a   :  { %317 = vmatprep.subr.mxu1 %v272_v4  ;;  %504 = vmatprep.subr.mxu0 %v396_v37  ;;  %v374_v50 = vld [vmem:[#allocation8 + $0x40] sm:$0xff]  ;;  %v389_v51 = vld [vmem:[#allocation8 + $0xb8] sm:$0xff]  ;;  %v388_v53 = vld [vmem:[#allocation8 + $0xb0] sm:$0xff] }
  0x5b   :  { %318 = vmatpush2.msra.mxu1 %v271_v0  ;;  %505 = vmatpush3.msra.mxu0 %v380_v38  ;;  %v373_v52 = vld [vmem:[#allocation8 + $0x38] sm:$0xff]  ;;  %v372_v54 = vld [vmem:[#allocation8 + $0x30] sm:$0xff]  ;;  %v387_v55 = vld [vmem:[#allocation8 + $0xa8] sm:$0xff]  ;;  %v119_v60 = vshrl.u32 %v118_v59, 7 }
  0x5c   :  { %319 = vmatprep.subr.mxu1 %v270_v5  ;;  %506 = vmatprep.subr.mxu0 %v395_v39  ;;  %v371_v56 = vld [vmem:[#allocation8 + $0x28] sm:$0xff]  ;;  %v386_v57 = vld [vmem:[#allocation8 + $0xa0] sm:$0xff]  ;;  %v116_v62 = vld [vmem:[%s751_s2] sm:$0x3] }
  0x5d   :  { %320 = vmatpush2.msra.mxu1 %v269_v6  ;;  %507 = vmatpush3.msra.mxu0 %v379_v40  ;;  %v370_v58 = vld [vmem:[#allocation8 + $0x20] sm:$0xff]  ;;  %v120_v61 = vsub.s32 0, %v119_v60  ;;  %v124_v63 = vsub.s32 1, %v119_v60  ;;  %v501_v38 = vld [vmem:[%s755_s6] ss:$0 sm:$0xff] }
  0x5e   :  { %321 = vmatprep.subr.mxu1 %v268_v7  ;;  %508 = vmatprep.subr.mxu0 %v394_v41 }
  0x5f   :  { %322 = vmatpush2.msra.mxu1 %v267_v8  ;;  %509 = vmatpush3.msra.mxu0 %v378_v42  ;;  %v121_v1 = vrot.slane %v116_v62, %v120_v61  ;;  %v125_v2 = vrot.slane %v116_v62, %v124_v63 }
  0x60   :  { %323 = vmatprep.subr.mxu1 %v266_v9  ;;  %510 = vmatprep.subr.mxu0 %v393_v43 }
  0x61   :  { %324 = vmatpush2.msra.mxu1 %v265_v10  ;;  %511 = vmatpush3.msra.mxu0 %v377_v44 }
  0x62   :  { %325 = vmatprep.subr.mxu1 %v264_v11  ;;  %512 = vmatprep.subr.mxu0 %v392_v45 }
  0x63   :  { %326 = vmatpush2.msra.mxu1 %v263_v12  ;;  %513 = vmatpush3.msra.mxu0 %v376_v46 }
  0x64   :  { %327 = vmatprep.subr.mxu1 %v262_v13  ;;  %514 = vmatprep.subr.mxu0 %v391_v47 }
  0x65   :  { %328 = vmatpush2.msra.mxu1 %v261_v14  ;;  %515 = vmatpush3.msra.mxu0 %v375_v48  ;;  %v385_v14 = vld [vmem:[#allocation8 + $0x98] sm:$0xff] }
  0x66   :  { %329 = vmatprep.subr.mxu1 %v260_v15  ;;  %516 = vmatprep.subr.mxu0 %v390_v49  ;;  %v369_v15 = vld [vmem:[#allocation8 + $0x18] sm:$0xff] }
  0x67   :  { %330 = vmatpush2.msra.mxu1 %v259_v16  ;;  %517 = vmatpush3.msra.mxu0 %v374_v50  ;;  %v384_v16 = vld [vmem:[#allocation8 + $0x90] sm:$0xff] }
  0x68   :  { %331 = vmatprep.subr.mxu1 %v258_v17  ;;  %518 = vmatprep.subr.mxu0 %v389_v51  ;;  %v368_v17 = vld [vmem:[#allocation8 + $0x10] sm:$0xff] }
  0x69   :  { %332 = vmatpush2.msra.mxu1 %v257_v18  ;;  %519 = vmatpush3.msra.mxu0 %v373_v52  ;;  %v383_v18 = vld [vmem:[#allocation8 + $0x88] sm:$0xff] }
  0x6a   :  { %333 = vmatprep.subr.mxu1 %v256_v19  ;;  %520 = vmatprep.subr.mxu0 %v388_v53  ;;  %v367_v19 = vld [vmem:[#allocation8 + $0x8] sm:$0xff] }
  0x6b   :  { %334 = vmatpush2.msra.mxu1 %v255_v20  ;;  %521 = vmatpush3.msra.mxu0 %v372_v54  ;;  %v382_v20 = vld [vmem:[#allocation8 + $0x80] sm:$0xff] }
  0x6c   :  { %335 = vmatprep.subr.mxu1 %v254_v21  ;;  %522 = vmatprep.subr.mxu0 %v387_v55  ;;  %v366_v21 = vld [vmem:[#allocation8] sm:$0xff] }
  0x6d   :  { %336 = vmatpush2.msra.mxu1 %v253_v22  ;;  %523 = vmatpush3.msra.mxu0 %v371_v56  ;;  %v273_v22 = vld [vmem:[%s753_s4] sm:$0x3] }
  0x6e   :  { %337 = vmatprep.subr.mxu1 %v252_v23  ;;  %524 = vmatprep.subr.mxu0 %v386_v57  ;;  %v278_v23 = vrot.slane %v273_v22, %v120_v61 }
  0x6f   :  { %338 = vmatpush2.msra.mxu1 %v251_v24  ;;  %525 = vmatpush3.msra.mxu0 %v370_v58  ;;  %v282_v24 = vrot.slane %v273_v22, %v124_v63 }
  0x70   :  { %339 = vmatprep.subr.mxu1 %v250_v25  ;;  %526 = vmatprep.subr.mxu0 %v385_v14 }
  0x71   :  { %340 = vmatpush2.msra.mxu1 %v249_v26  ;;  %527 = vmatpush3.msra.mxu0 %v369_v15 }
  0x72   :  { %341 = vmatprep.subr.mxu1 %v248_v27  ;;  %528 = vmatprep.subr.mxu0 %v384_v16 }
  0x73   :  { %342 = vmatpush2.msra.mxu1 %v247_v28  ;;  %529 = vmatpush3.msra.mxu0 %v368_v17 }
  0x74   :  { %343 = vmatprep.subr.mxu1 %v246_v29  ;;  %530 = vmatprep.subr.mxu0 %v383_v18 }
  0x75   :  { %344 = vmatpush2.msra.mxu1 %v245_v30  ;;  %531 = vmatpush3.msra.mxu0 %v367_v19 }
  0x76   :  { %345 = vmatprep.subr.mxu1 %v244_v31  ;;  %532 = vmatprep.subr.mxu0 %v382_v20 }
  0x77   :  { %346 = vmatpush2.msra.mxu1 %v243_v32  ;;  %533 = vmatpush3.msra.mxu0 %v366_v21 }
  0x78   :  { %347 = vmatprep.subr.mxu1 %v242_v33 }
  0x79   :  { %348 = vmatpush2.msra.mxu1 %v241_v34 }
 0x115   :  { %v194_v3 = vpop.f32.mrf.mxu0 }
 0x116   :  { %v195_v4 = vadd.f32 %v194_v3, %v121_v1 }
 0x117   :  { %v196_v0 = vpop.f32.mrf.mxu0 }
 0x118   :  { %v197_v5 = vadd.f32 %v196_v0, %v125_v2  ;;  %v205_v8 = vmax.f32 %v195_v4, 0.0 }
 0x119   :  { %v200_v6 = vpop.f32.mrf.mxu0 }
 0x11a   :  { %v206_v7 = vmax.f32 %v197_v5, 0.0  ;;  %v201_v9 = vadd.f32 %v200_v6, %v121_v1 }
 0x11b   :  { %v202_v10 = vpop.f32.mrf.mxu0 }
 0x11c   :  { %v203_v11 = vadd.f32 %v202_v10, %v125_v2  ;;  %349 = vmatprep.mubr.f32.mxu1 %v206_v7  ;;  %v207_v13 = vmax.f32 %v201_v9, 0.0 }
 0x11d   :  { %350 = vmatmul.mubr.f32.vlgmr.msra.gmra.mxu1 %v205_v8 }
 0x11e   :  { %v208_v12 = vmax.f32 %v203_v11, 0.0 }
 0x120   :  { %355 = vmatprep.mubr.f32.mxu1 %v208_v12 }
 0x121   :  { %356 = vmatmul.mubr.f32.gmra.mxu1 %v207_v13 }
 0x1dd   :  { %v351_v25 = vpop.f32.mrf.mxu1 }
 0x1de   :  { %v352_v26 = vadd.f32 %v351_v25, %v278_v23 }
 0x1df   :  { %v353_v27 = vpop.f32.mrf.mxu1 }
 0x1e0   :  { %v354_v28 = vadd.f32 %v353_v27, %v282_v24  ;;  %v362_v31 = vmax.f32 %v352_v26, 0.0 }
 0x1e1   :  { %v357_v29 = vpop.f32.mrf.mxu1 }
 0x1e2   :  { %v363_v30 = vmax.f32 %v354_v28, 0.0  ;;  %v358_v32 = vadd.f32 %v357_v29, %v278_v23 }
 0x1e3   :  { %v359_v33 = vpop.f32.mrf.mxu1 }
 0x1e4   :  { %v360_v34 = vadd.f32 %v359_v33, %v282_v24  ;;  %469 = vmatprep.mubr.f32.mxu0 %v363_v30  ;;  %v364_v36 = vmax.f32 %v358_v32, 0.0 }
 0x1e5   :  { %470 = vmatmul.mubr.f32.vlgmr.msra.gmra.mxu0 %v362_v31 }
 0x1e6   :  { %v365_v35 = vmax.f32 %v360_v34, 0.0 }
 0x1e8   :  { %474 = vmatprep.mubr.f32.mxu0 %v365_v35 }
 0x1e9   :  { %475 = vmatmul.mubr.f32.gmra.mxu0 %v364_v36 }
 0x2a5   :  { %v534_v37 = vpop.f32.mrf.mxu0 }
 0x2a7   :  { %v535_v39 = vpop.f32.mrf.mxu0 }
 0x2a8   :  { %v536_v40 = vadd.f32 %v535_v39, %v534_v37 }
 0x2a9   :  { %v537_v41 = vpop.f32.mrf.mxu0 }
 0x2aa   :  { %v472_v42 = vadd.f32 %v536_v40, %v501_v38 }
 0x2ab   :  { %v538_v43 = vpop.f32.mrf.mxu0 }
 0x2ac   :  { %480 = vst [vmem:[#allocation10] sm:$0xff] %v472_v42  ;;  %v539_v44 = vadd.f32 %v538_v43, %v537_v41 }
 0x2ae   :  { %v477_v45 = vadd.f32 %v539_v44, %v501_v38 }
 0x2b0   :  { %481 = vst [vmem:[#allocation10 + $0x8] sm:$0xff] %v477_v45 }
 0x2b1   :  { %641 = shalt.err (!%p638_p10)
}
 0x2b2   :  { %493 = dma.vmem_to_hbm [thread:$0]  %s488_s26, 256, %s756_s7, [#allocation4], %s662_s11, %s662_s11, %s663_s12  }
 0x2b3   :  { %656 = dma.done.wait [#allocation4], 256  }
 0x2b4   :  { %657 = vsyncadd [#allocation4], 4294967040 }
 0x2b5   :  { %497 = vsyncpa [#allocation3], 1 }
 0x2b6   :  { %498 = vsyncpa [#allocation6], 1 }
 0x2b7   :  { %499 = vsyncpa [#allocation9], 1 }
 0x2b8   :  { %500 = vsyncpa [#allocation4], 1 }

</bundles_post_ra>
